<compile_context>
chip_gen: v7x
topology: tpu7x:2x2x1
jax: 0.10.0
libtpu: 0.0.40
codegen_flags: <defaults>
</compile_context>

<pallas_src>
import functools
import math

import jax
import jax.numpy as jnp
from jax import lax
from jax.experimental import pallas as pl
from jax.experimental.pallas import tpu as pltpu


# ----------------------------------------------------------------------------
# Tiling helper: largest divisor <= target that is a multiple of `unit`
# (unit = 8 for sublane dims, 128 for lane dims).  Full extent is the legal
# fallback for ragged dims.
# ----------------------------------------------------------------------------
def _pick_tile(dim, target, unit=1):
    if dim <= target:
        return dim
    cap = (target // unit) * unit
    for cand in range(cap, 0, -unit):
        if dim % cand == 0:
            return cand
    # TODO(synk): pad ragged dims to a tile multiple instead of a full block.
    return dim


# ----------------------------------------------------------------------------
# Kernel: fused [pos-enc add] + LayerNorm prologue + matmul + bias (+ ReLU)
# Requires the full feature dim K (=d_model) in the block, which always holds
# here (d_model <= 512), so LN row statistics are computed in-kernel.
# ----------------------------------------------------------------------------
def _ln_linear_kernel(*refs, eps, activation, has_pe):
    it = iter(refs)
    x_ref = next(it)
    pe_ref = next(it) if has_pe else None
    g_ref, b_ref, w_ref, bias_ref, o_ref = (next(it), next(it), next(it),
                                            next(it), next(it))

    x = x_ref[...].astype(jnp.float32)
    if has_pe:
        x = x + pe_ref[...].astype(jnp.float32)
    # One-pass LN statistics: var = E[x^2] - mean^2 (single reduction sweep).
    mean = jnp.mean(x, axis=-1, keepdims=True)
    msq = jnp.mean(x * x, axis=-1, keepdims=True)
    var = msq - mean * mean
    y = (x - mean) * lax.rsqrt(var + eps)
    y = y * g_ref[...].astype(jnp.float32) + b_ref[...].astype(jnp.float32)

    out = jnp.dot(y.astype(w_ref.dtype), w_ref[...],
                  preferred_element_type=jnp.float32)
    out = out + bias_ref[...].astype(jnp.float32)
    if activation == "relu":
        out = jnp.maximum(out, 0.0)
    o_ref[...] = out.astype(o_ref.dtype)


def ln_linear(x, gamma, beta, w, b, *, pe=None, activation=None, eps=1e-5,
              ts_target=256, tn_target=256):
    """y = LN(x [+ pe]) @ w + b (optionally ReLU).  x: [B,S,D] -> [B,S,N]."""
    B, S, D = x.shape
    Dw, N = w.shape
    assert D == Dw
    ts = _pick_tile(S, ts_target, unit=8)
    tn = _pick_tile(N, tn_target, unit=128)
    has_pe = pe is not None
    if has_pe and ts % 8 != 0 and ts != pe.shape[0]:
        pe = pe[:S]  # full-extent pe block keeps the (8,128) rule satisfied

    in_specs = [pl.BlockSpec((None, ts, D), lambda bb, ss, jj: (bb, ss, 0))]
    args = [x]
    if has_pe:
        in_specs.append(pl.BlockSpec((ts, D), lambda bb, ss, jj: (ss, 0)))
        args.append(pe)
    in_specs += [
        pl.BlockSpec((1, D), lambda bb, ss, jj: (0, 0)),
        pl.BlockSpec((1, D), lambda bb, ss, jj: (0, 0)),
        pl.BlockSpec((D, tn), lambda bb, ss, jj: (0, jj)),
        pl.BlockSpec((1, tn), lambda bb, ss, jj: (0, jj)),
    ]
    args += [gamma.reshape(1, D), beta.reshape(1, D), w, b.reshape(1, N)]

    return pl.pallas_call(
        functools.partial(_ln_linear_kernel, eps=eps, activation=activation,
                          has_pe=has_pe),
        out_shape=jax.ShapeDtypeStruct((B, S, N), x.dtype),
        grid=(B, S // ts, N // tn),
        in_specs=in_specs,
        out_specs=pl.BlockSpec((None, ts, tn), lambda bb, ss, jj: (bb, ss, jj)),
        compiler_params=pltpu.CompilerParams(
            dimension_semantics=("parallel", "parallel", "parallel")),
    )(*args)


# ----------------------------------------------------------------------------
# Kernel: K-tiled matmul + bias (+ ReLU) with fused residual(s) (+ pe) epilogue
# ----------------------------------------------------------------------------
def _linear_kernel(*refs, activation, n_res, has_pe, pe_scale):
    x_ref, w_ref, b_ref = refs[:3]
    res_refs = refs[3:3 + n_res]
    idx = 3 + n_res
    pe_ref = refs[idx] if has_pe else None
    idx += 1 if has_pe else 0
    o_ref, acc_ref = refs[idx], refs[idx + 1]

    @pl.when(pl.program_id(3) == 0)
    def _():
        acc_ref[...] = jnp.zeros_like(acc_ref)

    acc_ref[...] += jnp.dot(x_ref[...], w_ref[...],
                            preferred_element_type=jnp.float32)

    @pl.when(pl.program_id(3) == pl.num_programs(3) - 1)
    def _():
        out = acc_ref[...] + b_ref[...].astype(jnp.float32)
        if activation == "relu":
            out = jnp.maximum(out, 0.0)
        for r_ref in res_refs:
            out = out + r_ref[...].astype(jnp.float32)
        if has_pe:
            out = out + pe_scale * pe_ref[...].astype(jnp.float32)
        o_ref[...] = out.astype(o_ref.dtype)


def linear(x, w, b, *, residuals=(), pe=None, pe_scale=1.0, activation=None,
           ts_target=256, tn_target=256, tk_target=512):
    """y = x @ w + b [+ relu] [+ sum(residuals)] [+ pe_scale*pe], x: [B,S,K]."""
    B, S, K = x.shape
    Kw, N = w.shape
    assert K == Kw
    ts = _pick_tile(S, ts_target, unit=8)
    tn = _pick_tile(N, tn_target, unit=128)
    tk = _pick_tile(K, tk_target, unit=128)
    has_pe = pe is not None
    if has_pe and ts % 8 != 0 and ts != pe.shape[0]:
        pe = pe[:S]

    in_specs = [
        pl.BlockSpec((None, ts, tk), lambda bb, ss, jj, kk: (bb, ss, kk)),
        pl.BlockSpec((tk, tn), lambda bb, ss, jj, kk: (kk, jj)),
        pl.BlockSpec((1, tn), lambda bb, ss, jj, kk: (0, jj)),
    ]
    args = [x, w, b.reshape(1, N)]
    for r in residuals:
        in_specs.append(
            pl.BlockSpec((None, ts, tn), lambda bb, ss, jj, kk: (bb, ss, jj)))
        args.append(r)
    if has_pe:
        in_specs.append(pl.BlockSpec((ts, tn), lambda bb, ss, jj, kk: (ss, jj)))
        args.append(pe)

    return pl.pallas_call(
        functools.partial(_linear_kernel, activation=activation,
                          n_res=len(residuals), has_pe=has_pe,
                          pe_scale=pe_scale),
        out_shape=jax.ShapeDtypeStruct((B, S, N), x.dtype),
        grid=(B, S // ts, N // tn, K // tk),
        in_specs=in_specs,
        out_specs=pl.BlockSpec((None, ts, tn), lambda bb, ss, jj, kk: (bb, ss, jj)),
        scratch_shapes=[pltpu.VMEM((ts, tn), jnp.float32)],
        compiler_params=pltpu.CompilerParams(
            dimension_semantics=("parallel", "parallel", "parallel", "arbitrary")),
    )(*args)


# ----------------------------------------------------------------------------
# Kernel: multi-head attention over a lane-dense head group (no transposes)
# ----------------------------------------------------------------------------
def _attention_kernel(q_ref, k_ref, v_ref, o_ref, *, gh, dh, scale):
    outs = []
    for h in range(gh):  # static unroll over the heads packed in this group
        sl = slice(h * dh, (h + 1) * dh)
        q = q_ref[:, sl].astype(jnp.float32)              # (tq, dh)
        k = k_ref[:, sl].astype(jnp.float32)              # (S,  dh)
        v = v_ref[:, sl]                                   # (S,  dh)
        s = lax.dot_general(q, k, (((1,), (1,)), ((), ())),
                            preferred_element_type=jnp.float32) * scale
        m = jnp.max(s, axis=-1, keepdims=True)
        p = jnp.exp(s - m)
        l = jnp.sum(p, axis=-1, keepdims=True)
        o = jnp.dot(p.astype(v.dtype), v, preferred_element_type=jnp.float32)
        # Deferred softmax normalization (EUP reciprocal, O(tq*dh) multiplies).
        outs.append(o * pl.reciprocal(l, approx=True))
    res = outs[0] if gh == 1 else jnp.concatenate(outs, axis=-1)
    o_ref[...] = res.astype(o_ref.dtype)                   # lane-dense store


def _pick_head_group(nhead, dh):
    best = 1
    for gh in range(1, nhead + 1):
        if nhead % gh == 0 and gh * dh <= 128:
            best = gh
    return best


def multihead_attention(q_arr, kv_arr, *, d_model, nhead, k_off, v_off,
                        tq_target=256):
    """q_arr: [B,S,*] holding Q columns at offset 0; kv_arr: [B,S,*] holding K
    at column offset k_off and V at v_off (same array as q_arr for encoder
    layers).  Returns concatenated heads [B,S,d_model]."""
    B, S, _ = q_arr.shape
    dh = d_model // nhead
    gh = _pick_head_group(nhead, dh)          # heads per 128-lane group
    gw = gh * dh                              # group width in lanes
    n_groups = nhead // gh
    tq = _pick_tile(S, tq_target, unit=8)
    kq, vq = k_off // gw, v_off // gw         # column-block offsets
    # TODO(synk): for production-long S switch to a KV-tiled online-softmax
    # (flash) variant so the (tq,S) scores and full-S K/V blocks stay within
    # v7x's 64 MiB / v5e's 16 MiB scoped-VMEM budgets.
    return pl.pallas_call(
        functools.partial(_attention_kernel, gh=gh, dh=dh,
                          scale=1.0 / math.sqrt(dh)),
        out_shape=jax.ShapeDtypeStruct((B, S, d_model), q_arr.dtype),
        grid=(B, n_groups, S // tq),
        in_specs=[
            pl.BlockSpec((None, tq, gw), lambda bb, gg, qi: (bb, qi, gg)),
            pl.BlockSpec((None, S, gw), lambda bb, gg, qi: (bb, 0, gg + kq)),
            pl.BlockSpec((None, S, gw), lambda bb, gg, qi: (bb, 0, gg + vq)),
        ],
        out_specs=pl.BlockSpec((None, tq, gw), lambda bb, gg, qi: (bb, qi, gg)),
        compiler_params=pltpu.CompilerParams(
            dimension_semantics=("parallel", "parallel", "parallel")),
    )(q_arr, kv_arr, kv_arr)


# ----------------------------------------------------------------------------
# Layer composition (matches the PyTorch pre-norm forward graphs exactly)
# ----------------------------------------------------------------------------
def _ffn(h, lp):
    """h + W2 @ relu(W1 @ LN2(h) + b1) + b2 — LN fused into the first matmul,
    residual fused into the second."""
    f1 = ln_linear(h, lp["ln2_g"], lp["ln2_b"], lp["w1"], lp["b1"],
                   activation="relu")
    return linear(f1, lp["w2"], lp["b2"], residuals=(h,))


def cross_transformer_block(x, video, pe_table, layers):
    """x (audio), video: [B,S,D]. Mirrors CrossTransformerBlock.forward; the
    module's entry/exit permutes cancel under batch-first layout.
    TODO(synk): training-mode dropout (p>0) not implemented; defaults are 0.0
    so every dropout is identity."""
    B, S, D = x.shape

    # ---- cross-attention layer (pos-enc fused; PE'd tensors never hit HBM)
    lp = layers[0]
    q = ln_linear(video, lp["ln1_g"], lp["ln1_b"], lp["wq"], lp["bq"],
                  pe=pe_table)                       # Q from LN(video + pe)
    kv = ln_linear(x, lp["ln1_g"], lp["ln1_b"], lp["wkv"], lp["bkv"],
                   pe=pe_table)                      # fused K|V from LN(x + pe)
    attn = multihead_attention(q, kv, d_model=D, nhead=lp["nhead"],
                               k_off=0, v_off=D)
    # h = (x + pe) + (video + pe) + attn @ Wo + bo, all in one epilogue
    h = linear(attn, lp["wo"], lp["bo"], residuals=(x, video),
               pe=pe_table, pe_scale=2.0)
    h = _ffn(h, lp)

    # ---- standard pre-norm TransformerEncoderLayers
    for lp in layers[1:]:
        qkv = ln_linear(h, lp["ln1_g"], lp["ln1_b"], lp["wqkv"], lp["bqkv"])
        attn = multihead_attention(qkv, qkv, d_model=D, nhead=lp["nhead"],
                                   k_off=D, v_off=2 * D)
        h = linear(attn, lp["wo"], lp["bo"], residuals=(h,))
        h = _ffn(h, lp)
    return h


# ----------------------------------------------------------------------------
# Parameter / table construction (deterministic, in-script)
# ----------------------------------------------------------------------------
def make_positional_encoding_table(max_len, d_model, dtype=jnp.float32):
    """Matches PositionalEncoding.__init__ (sin on even, cos on odd indices)."""
    position = jnp.arange(max_len, dtype=jnp.float32)[:, None]
    div_term = jnp.exp(jnp.arange(0, d_model, 2, dtype=jnp.float32)
                       * (-math.log(10000.0) / d_model))
    angles = position * div_term
    pe = jnp.zeros((max_len, d_model), dtype=jnp.float32)
    pe = pe.at[:, 0::2].set(jnp.sin(angles))
    pe = pe.at[:, 1::2].set(jnp.cos(angles))
    return pe.astype(dtype)


def init_layer_params(key, d_model, d_ffn, nhead, *, cross, dtype=jnp.float32):
    """Weights stored [in, out] (transpose of torch nn.Linear / in_proj), with
    Q/K/V pre-fused: [D,2D] K|V for the cross layer, [D,3D] Q|K|V otherwise."""
    ks = jax.random.split(key, 12)

    def w(k, shape, scale):
        return (jax.random.normal(k, shape, jnp.float32) * scale).astype(dtype)

    sa = 1.0 / math.sqrt(d_model)
    wq, bq = w(ks[0], (d_model, d_model), sa), w(ks[1], (d_model,), 0.02)
    wk, bk = w(ks[2], (d_model, d_model), sa), w(ks[3], (d_model,), 0.02)
    wv, bv = w(ks[4], (d_model, d_model), sa), w(ks[5], (d_model,), 0.02)
    p = dict(
        nhead=nhead,
        wo=w(ks[6], (d_model, d_model), sa), bo=w(ks[7], (d_model,), 0.02),
        w1=w(ks[8], (d_model, d_ffn), sa), b1=w(ks[9], (d_ffn,), 0.02),
        w2=w(ks[10], (d_ffn, d_model), 1.0 / math.sqrt(d_ffn)),
        b2=w(ks[11], (d_model,), 0.02),
        ln1_g=jnp.ones((d_model,), dtype), ln1_b=jnp.zeros((d_model,), dtype),
        ln2_g=jnp.ones((d_model,), dtype), ln2_b=jnp.zeros((d_model,), dtype),
    )
    if cross:
        p.update(wq=wq, bq=bq,
                 wkv=jnp.concatenate([wk, wv], axis=1),
                 bkv=jnp.concatenate([bk, bv]))
    else:
        p.update(wqkv=jnp.concatenate([wq, wk, wv], axis=1),
                 bqkv=jnp.concatenate([bq, bk, bv]))
    return p


# ----------------------------------------------------------------------------
# Pure-JAX reference (validates the Pallas composition)
# ----------------------------------------------------------------------------
def _ref_layer_norm(x, g, b, eps=1e-5):
    m = x.mean(-1, keepdims=True)
    v = ((x - m) ** 2).mean(-1, keepdims=True)
    return (x - m) / jnp.sqrt(v + eps) * g + b


def _ref_mha(q_src, kv_src, wq, bq, wk, bk, wv, bv, wo, bo, nhead):
    B, S, D = q_src.shape
    dh = D // nhead
    hi = lax.Precision.HIGHEST
    q = jnp.dot(q_src, wq, precision=hi) + bq
    k = jnp.dot(kv_src, wk, precision=hi) + bk
    v = jnp.dot(kv_src, wv, precision=hi) + bv

    def split(t):
        return t.reshape(B, S, nhead, dh).transpose(0, 2, 1, 3)

    q, k, v = split(q), split(k), split(v)
    s = jnp.einsum("bhqd,bhkd->bhqk", q, k, precision=hi) / math.sqrt(dh)
    p = jax.nn.softmax(s, axis=-1)
    o = jnp.einsum("bhqk,bhkd->bhqd", p, v, precision=hi)
    o = o.transpose(0, 2, 1, 3).reshape(B, S, D)
    return jnp.dot(o, wo, precision=hi) + bo


def _ref_ffn(x, lp):
    hi = lax.Precision.HIGHEST
    h = jnp.maximum(jnp.dot(x, lp["w1"], precision=hi) + lp["b1"], 0.0)
    return jnp.dot(h, lp["w2"], precision=hi) + lp["b2"]


def _ref_block(x, video, pe_table, layers):
    B, S, D = x.shape
    pe = pe_table[:S][None].astype(jnp.float32)
    x = x + pe
    v = video + pe
    lp = layers[0]
    nx = _ref_layer_norm(x, lp["ln1_g"], lp["ln1_b"])
    nv = _ref_layer_norm(v, lp["ln1_g"], lp["ln1_b"])
    wk, wv_ = lp["wkv"][:, :D], lp["wkv"][:, D:]
    bk, bv_ = lp["bkv"][:D], lp["bkv"][D:]
    h = x + v + _ref_mha(nv, nx, lp["wq"], lp["bq"], wk, bk, wv_, bv_,
                         lp["wo"], lp["bo"], lp["nhead"])
    h = h + _ref_ffn(_ref_layer_norm(h, lp["ln2_g"], lp["ln2_b"]), lp)
    for lp in layers[1:]:
        nh = _ref_layer_norm(h, lp["ln1_g"], lp["ln1_b"])
        wq, wk, wv_ = (lp["wqkv"][:, :D], lp["wqkv"][:, D:2 * D],
                       lp["wqkv"][:, 2 * D:])
        bq, bk, bv_ = lp["bqkv"][:D], lp["bqkv"][D:2 * D], lp["bqkv"][2 * D:]
        h = h + _ref_mha(nh, nh, wq, bq, wk, bk, wv_, bv_,
                         lp["wo"], lp["bo"], lp["nhead"])
        h = h + _ref_ffn(_ref_layer_norm(h, lp["ln2_g"], lp["ln2_b"]), lp)
    return h


# ----------------------------------------------------------------------------
if __name__ == "__main__":
    # Small shapes consistent with the module: batch=2, seq=8, d_model=32,
    # nhead=4, d_ffn=64, num_layers=2 (1 cross layer + 1 encoder layer).
    B, S, D_MODEL, NHEAD, D_FFN, NUM_LAYERS, MAX_LEN = 2, 8, 32, 4, 64, 2, 64

    key = jax.random.PRNGKey(0)
    kx, kvid, kp = jax.random.split(key, 3)
    x = jax.random.normal(kx, (B, S, D_MODEL), dtype=jnp.float32)
    video = jax.random.normal(kvid, (B, S, D_MODEL), dtype=jnp.float32)

    pe_table = make_positional_encoding_table(MAX_LEN, D_MODEL, dtype=x.dtype)
    layer_keys = jax.random.split(kp, NUM_LAYERS)
    layers = [init_layer_params(layer_keys[0], D_MODEL, D_FFN, NHEAD, cross=True)]
    layers += [init_layer_params(k, D_MODEL, D_FFN, NHEAD, cross=False)
               for k in layer_keys[1:]]

    out = jax.block_until_ready(cross_transformer_block(x, video, pe_table, layers))
    assert out.shape == (B, S, D_MODEL)

    ref = _ref_block(x, video, pe_table, layers)
    err = float(jnp.max(jnp.abs(out - ref)))
    # Kernel matmuls use the MXU default (bf16-pass) precision and an approx
    # EUP reciprocal for the softmax denominator; the reference is HIGHEST.
    assert jnp.allclose(out, ref, atol=2e-2, rtol=2e-2), f"max abs err {err}"

    print("KERNEL_OK")
</pallas_src>

<mosaic_0001>
module attributes {stable_mosaic.version = 11 : i64} {
  func.func @_ln_linear_kernel(%arg0: i32, %arg1: i32, %arg2: i32, %arg3: memref<1x8x32xf32, #tpu.memory_space<vmem>>, %arg4: memref<8x32xf32, #tpu.memory_space<vmem>>, %arg5: memref<1x32xf32, #tpu.memory_space<vmem>>, %arg6: memref<1x32xf32, #tpu.memory_space<vmem>>, %arg7: memref<32x32xf32, #tpu.memory_space<vmem>>, %arg8: memref<1x32xf32, #tpu.memory_space<vmem>>, %arg9: memref<1x8x32xf32, #tpu.memory_space<vmem>>) attributes {dimension_semantics = [#tpu.dimension_semantics<parallel>, #tpu.dimension_semantics<parallel>, #tpu.dimension_semantics<parallel>], iteration_bounds = array<i64: 2, 1, 1>, scalar_prefetch = 0 : i64, scratch_operands = 0 : i64, tpu.core_type = #tpu.core_type<tc>, window_params = [{transform_indices = @transform_0, window_bounds = array<i64: 1, 8, 32>}, {transform_indices = @transform_1, window_bounds = array<i64: 8, 32>}, {pipeline_mode = #tpu.pipeline_mode<synchronous>, transform_indices = @transform_2, window_bounds = array<i64: 1, 32>}, {pipeline_mode = #tpu.pipeline_mode<synchronous>, transform_indices = @transform_3, window_bounds = array<i64: 1, 32>}, {transform_indices = @transform_4, window_bounds = array<i64: 32, 32>}, {transform_indices = @transform_5, window_bounds = array<i64: 1, 32>}, {transform_indices = @transform_6, window_bounds = array<i64: 1, 8, 32>}]} {
    %c0 = arith.constant 0 : index
    %c0_0 = arith.constant 0 : index
    %c0_1 = arith.constant 0 : index
    %0 = vector.load %arg3[%c0, %c0_0, %c0_1] : memref<1x8x32xf32, #tpu.memory_space<vmem>>, vector<1x8x32xf32>
    %1 = vector.shape_cast %0 : vector<1x8x32xf32> to vector<8x32xf32>
    %c0_2 = arith.constant 0 : index
    %c0_3 = arith.constant 0 : index
    %2 = vector.load %arg4[%c0_2, %c0_3] : memref<8x32xf32, #tpu.memory_space<vmem>>, vector<8x32xf32>
    %3 = arith.addf %1, %2 : vector<8x32xf32>
    %cst = arith.constant dense<0.000000e+00> : vector<8xf32>
    %4 = vector.multi_reduction <add>, %3, %cst [1] : vector<8x32xf32> to vector<8xf32>
    %5 = vector.shape_cast %4 : vector<8xf32> to vector<8x1xf32>
    %cst_4 = arith.constant 3.200000e+01 : f32
    %6 = vector.broadcast %cst_4 : f32 to vector<8x1xf32>
    %7 = arith.divf %5, %6 : vector<8x1xf32>
    %8 = arith.mulf %3, %3 : vector<8x32xf32>
    %cst_5 = arith.constant dense<0.000000e+00> : vector<8xf32>
    %9 = vector.multi_reduction <add>, %8, %cst_5 [1] : vector<8x32xf32> to vector<8xf32>
    %10 = vector.shape_cast %9 : vector<8xf32> to vector<8x1xf32>
    %cst_6 = arith.constant 3.200000e+01 : f32
    %11 = vector.broadcast %cst_6 : f32 to vector<8x1xf32>
    %12 = arith.divf %10, %11 : vector<8x1xf32>
    %13 = arith.mulf %7, %7 : vector<8x1xf32>
    %14 = arith.subf %12, %13 : vector<8x1xf32>
    %15 = vector.broadcast %7 : vector<8x1xf32> to vector<8x32xf32>
    %16 = arith.subf %3, %15 : vector<8x32xf32>
    %cst_7 = arith.constant 9.99999974E-6 : f32
    %17 = vector.broadcast %cst_7 : f32 to vector<8x1xf32>
    %18 = arith.addf %14, %17 : vector<8x1xf32>
    %19 = math.rsqrt %18 : vector<8x1xf32>
    %20 = vector.broadcast %19 : vector<8x1xf32> to vector<8x32xf32>
    %21 = arith.mulf %16, %20 : vector<8x32xf32>
    %c0_8 = arith.constant 0 : index
    %c0_9 = arith.constant 0 : index
    %22 = vector.load %arg5[%c0_8, %c0_9] : memref<1x32xf32, #tpu.memory_space<vmem>>, vector<1x32xf32>
    %23 = vector.broadcast %22 : vector<1x32xf32> to vector<8x32xf32>
    %24 = arith.mulf %21, %23 : vector<8x32xf32>
    %c0_10 = arith.constant 0 : index
    %c0_11 = arith.constant 0 : index
    %25 = vector.load %arg6[%c0_10, %c0_11] : memref<1x32xf32, #tpu.memory_space<vmem>>, vector<1x32xf32>
    %26 = vector.broadcast %25 : vector<1x32xf32> to vector<8x32xf32>
    %27 = arith.addf %24, %26 : vector<8x32xf32>
    %c0_12 = arith.constant 0 : index
    %c0_13 = arith.constant 0 : index
    %28 = vector.load %arg7[%c0_12, %c0_13] : memref<32x32xf32, #tpu.memory_space<vmem>>, vector<32x32xf32>
    %cst_14 = arith.constant dense<0.000000e+00> : vector<8x32xf32>
    %29 = tpu.matmul %27, %28, %cst_14 {dimension_numbers = #tpu.dot_dimension_numbers<[1], [0], [0], [1], [0, 0, 1, 1], [], []>} : vector<8x32xf32>, vector<32x32xf32>, vector<8x32xf32> -> vector<8x32xf32>
    %c0_15 = arith.constant 0 : index
    %c0_16 = arith.constant 0 : index
    %30 = vector.load %arg8[%c0_15, %c0_16] : memref<1x32xf32, #tpu.memory_space<vmem>>, vector<1x32xf32>
    %31 = vector.broadcast %30 : vector<1x32xf32> to vector<8x32xf32>
    %32 = arith.addf %29, %31 : vector<8x32xf32>
    %c0_17 = arith.constant 0 : index
    %c0_18 = arith.constant 0 : index
    %c0_19 = arith.constant 0 : index
    %33 = vector.load %arg9[%c0_17, %c0_18, %c0_19] : memref<1x8x32xf32, #tpu.memory_space<vmem>>, vector<1x8x32xf32>
    %34 = vector.shape_cast %33 : vector<1x8x32xf32> to vector<8x32xf32>
    %35 = vector.shape_cast %32 : vector<8x32xf32> to vector<1x8x32xf32>
    tpu.vector_store %arg9[%c0_17, %c0_18, %c0_19], %35 {strides = array<i32>} : memref<1x8x32xf32, #tpu.memory_space<vmem>>, vector<1x8x32xf32>,
    return
  }
  func.func @transform_0(%arg0: i32, %arg1: i32, %arg2: i32) -> (i32, i32, i32) {
    %c0_i32 = arith.constant 0 : i32
    %c0_i32_0 = arith.constant 0 : i32
    return %arg0, %arg1, %c0_i32 : i32, i32, i32
  }
  func.func @transform_1(%arg0: i32, %arg1: i32, %arg2: i32) -> (i32, i32) {
    %c0_i32 = arith.constant 0 : i32
    %c0_i32_0 = arith.constant 0 : i32
    return %arg1, %c0_i32 : i32, i32
  }
  func.func @transform_2(%arg0: i32, %arg1: i32, %arg2: i32) -> (i32, i32) {
    %c0_i32 = arith.constant 0 : i32
    %c0_i32_0 = arith.constant 0 : i32
    %c0_i32_1 = arith.constant 0 : i32
    return %c0_i32, %c0_i32_0 : i32, i32
  }
  func.func @transform_3(%arg0: i32, %arg1: i32, %arg2: i32) -> (i32, i32) {
    %c0_i32 = arith.constant 0 : i32
    %c0_i32_0 = arith.constant 0 : i32
    %c0_i32_1 = arith.constant 0 : i32
    return %c0_i32, %c0_i32_0 : i32, i32
  }
  func.func @transform_4(%arg0: i32, %arg1: i32, %arg2: i32) -> (i32, i32) {
    %c0_i32 = arith.constant 0 : i32
    %c0_i32_0 = arith.constant 0 : i32
    return %c0_i32, %arg2 : i32, i32
  }
  func.func @transform_5(%arg0: i32, %arg1: i32, %arg2: i32) -> (i32, i32) {
    %c0_i32 = arith.constant 0 : i32
    %c0_i32_0 = arith.constant 0 : i32
    return %c0_i32, %arg2 : i32, i32
  }
  func.func @transform_6(%arg0: i32, %arg1: i32, %arg2: i32) -> (i32, i32, i32) {
    %c0_i32 = arith.constant 0 : i32
    return %arg0, %arg1, %arg2 : i32, i32, i32
  }
}

</mosaic_0001>

<bundles_post_ra>
// kernel: tpu_custom_call.1
= control target key start
LH: loop header
LB: loop body
LE: loop exit
PB: predicated region body
PF: predicated region fallthrough
CT: control target
= control target key end

     0   :  { %11 = vsyncpa [#allocation3], 0  ;;  %s942_s0 = inlined_call_operand.vmem [shape: f32[2,8,32], index: 0, kind: input, shape index: {}]   ;;  %s943_s1 = inlined_call_operand.vmem [shape: f32[64,32], index: 1, kind: input, shape index: {}]   ;;  %s944_s2 = inlined_call_operand.vmem [shape: f32[1,32], index: 2, kind: input, shape index: {}]   ;;  %s945_s3 = inlined_call_operand.vmem [shape: f32[1,32], index: 3, kind: input, shape index: {}]   ;;  %s946_s4 = inlined_call_operand.vmem [shape: f32[32,32], index: 4, kind: input, shape index: {}]   ;;  %s947_s5 = inlined_call_operand.vmem [shape: f32[1,32], index: 5, kind: input, shape index: {}]   ;;  %s948_s6 = inlined_call_operand.hbm [shape: f32[2,8,32], index: 6, kind: output, shape index: {}]  }
   0x1   :  { %13 = vsyncpa [#allocation3 + $0x1], 0  ;;  %s802_s21 = smov 0   ;;  %s804_s22 = smov 0  }
   0x2   :  { %s806_s23 = smov 0   ;;  %s808_s24 = smov 0  }
   0x3   :  { %s810_s25 = smov 0   ;;  %s812_s26 = smov 0  }
   0x4 LB: > { %s583_s27 = sadd.s32 4294967295, %s761_s26   ;;  %s584_s28 = sadd.s32 4294967294, %s761_s26   ;;  %s761_s26 = sphi %s812_s26, %s19_s26   ;;  %s757_s25 = sphi %s810_s25, %s955_s25   ;;  %s753_s24 = sphi %s808_s24, %s954_s24   ;;  %s749_s23 = sphi %s806_s23, %s953_s23   ;;  %s745_s22 = sphi %s804_s22, %s952_s22   ;;  %s741_s21 = sphi %s802_s21, %s951_s21  }
   0x5   : > { %s38_s29 = sadd.s32 1, %s757_s25  ;;  %s197_s30 = sadd.s32 1, %s749_s23 }
   0x6   : > { %p40_p0 = scmp.ge.s32.totalorder %s38_s29, 2  ;;  %p207_p1 = scmp.ne.s32.totalorder %s749_s23, %s745_s22 }
   0x7   : > { %p208_p2 = scmp.eq.s32.totalorder %s583_s27, 1  ;;  %p213_p3 = scmp.ne.s32.totalorder %s745_s22, %s741_s21 }
   0x8   : > { %s957_s29 = smov (%p40_p0, %s38_s29), 0  ;;  %p214_p5 = scmp.eq.s32.totalorder %s584_s28, 1 }
   0x9   : > { %p842_p4 = por %p208_p2, %p207_p1  ;;  %s190_s8 = ssub.s32 %s757_s25, %s957_s29 }
   0xa   : > { %p590_p6 = scmp.ge.s32.totalorder %s761_s26, 1  ;;  %p195_p7 = scmp.eq.s32.totalorder %s190_s8, 0 }
   0xb   : > { %p849_p8 = por %p214_p5, %p213_p3  ;;  %p268_p9 = scmp.lt.s32.totalorder %s761_s26, 3 }
   0xc   : > { %s855_s10 = scalar_select %p195_p7, %s749_s23, %s197_s30  }
   0xd   : > { %p269_p10 = pnand %p590_p6, %p268_p9 }
   0xe   : > { %p311_p11 = scmp.lt.s32.totalorder (!%p269_p10), %s753_s24, 1  ;;  %v330_v0 = vld [vmem:[%s943_s1] sm:$0xff] (!%p269_p10)  ;;  %vm332_vm0 = vcmask (!%p269_p10), 261120   ;;  %v366_v7 = vld [vmem:[%s946_s4 + $0x8] sm:$0xff] (!%p269_p10)  ;;  %v367_v8 = vld [vmem:[%s946_s4 + $0x10] sm:$0xff] (!%p269_p10)  ;;  %v763_v9 = vmov (!%p269_p10), 0.0|0.0  }
   0xf   : > { %272 = sbr.rel (%p269_p10) target bundleno = 427 (0x1ab), region = 44  ;;  %v365_v6 = vld [vmem:[%s946_s4] sm:$0xff] (!%p269_p10)  ;;  %617 = vmatprep.subr.bf16.mxu0 (!%p269_p10), %v763_v9  ;;  %v368_v11 = vld [vmem:[%s946_s4 + $0x18] sm:$0xff] (!%p269_p10)  ;;  %vm764_vm1 = vmmov (!%p269_p10), 0   ;;  %v765_v12 = vmov (!%p269_p10), 0.0   ;;  %s308_s16 = sand.u32 (!%p269_p10), 1, %s745_s22  }
  0x10   : > { %v618_v10 = vpack.c.bf16 (!%p269_p10), %v366_v7, %v365_v6  ;;  %614 = vmatprep.mubr.msk.f32.mxu0 (!%p269_p10), %vm764_vm1, %v765_v12  ;;  %v621_v13 = vpack.c.bf16 (!%p269_p10), %v368_v11, %v367_v8  ;;  %v593_v23 = vld [vmem:[%s944_s2] ss:$0 sm:$0xff] (!%p269_p10)  ;;  %s598_s20 = sshll.u32 (!%p269_p10), %s753_s24, 7 }
  0x11   : > { %v594_v25 = vld [vmem:[%s945_s3] ss:$0 sm:$0xff] (!%p269_p10) }
  0x12   : > { %619 = vmatpush3.bf16.msra.mxu0 (!%p269_p10), %v618_v10  ;;  %v595_v28 = vld [vmem:[%s947_s5] ss:$0 sm:$0xff] (!%p269_p10) }
  0x13   : > { %620 = vmatprep.subr.bf16.mxu0 (!%p269_p10), %v763_v9 }
  0x16   : > { %s312_s11 = scalar_select %p311_p11, %s753_s24, 1  ;;  %622 = vmatpush3.bf16.msra.mxu0 %v621_v13 }
  0x17   : > { %s766_s24 = smov [#allocation2]  }
  0x18   : > { %s592_s12 = sshll.u32 %s312_s11, 3  ;;  %s894_s11 = scalar_lea.hbm %s948_s6, %s598_s20 }
  0x19   : > { %s317_s17 = scalar_lea.vmem %s942_s0, %s592_s12  ;;  %s451_s12 = scalar_lea.sflag [#allocation3], %s308_s16 }
  0x1a   : > { %v329_v1 = vld [vmem:[%s317_s17] sm:$0xff]  ;;  %s591_s17 = sshll.u32 %s308_s16, 3  ;;  %s687_s14 = sshll.u32 %s766_s24, 4  ;;  %s688_s14 = int_to_ptr.vmem [resolvable:$false] %s687_s14 }
  0x1b   : > { %v331_v2 = vadd.f32 %v330_v0, %v329_v1  ;;  %s310_s27 = scalar_lea.vmem [#allocation2], %s591_s17  ;;  %s689_s15 = scalar_lea.vmem %s688_s14, 256 }
  0x1c   : > { %s466_s28 = sshll.u32 %s310_s27, 4  ;;  %s896_s28 = int_to_ptr.vmem [resolvable:$true] %s466_s28 }
  0x1d   : > { %v333_v3 = vsel %vm332_vm0, %v331_v2, 0.0  ;;  %v338_v4 = vmul.f32 %v331_v2, %v331_v2  ;;  %s683_s13 = scalar_lea.vmem %s896_s28, 128  ;;  %p690_p1 = scmp.lt.s32.totalorder %s896_s28, %s688_s14 }
  0x1e   : > { %334 = vadd.xlane.f32.xlu0 %v333_v3  ;;  %p684_p12 = scmp.ne.s32.totalorder %s896_s28, %s683_s13  ;;  %p691_p2 = scmp.lt.s32.totalorder %s689_s15, %s683_s13 }
  0x1f   : > { %v339_v5 = vsel %vm332_vm0, %v338_v4, 0.0 }
  0x20   : > { %p685_p13 = pnand %p684_p12, %p842_p4  ;;  %p692_p3 = por %p691_p2, %p690_p1 }
  0x22   : > { %340 = vadd.xlane.f32.xlu0 %v339_v5  ;;  %p686_p0 = pneg %p685_p13 }
  0x24   : > { %p693_p5 = pnand %p692_p3, %p686_p0 }
  0xab   : > { %v335_v14 = vpop.xlane.xlu0 %334 }
  0xac   : > { %v337_v15 = vmul.f32 0.03125, %v335_v14 }
  0xae   : > { %v343_v17 = vmul.f32 %v337_v15, %v337_v15  ;;  %v345_v21 = vsub.f32 %v331_v2, %v337_v15 }
  0xaf   : > { %v341_v16 = vpop.xlane.xlu0 %340 }
  0xb0   : > { %v342_v18 = vmul.f32 0.03125, %v341_v16 }
  0xb2   : > { %v344_v19 = vsub.f32 %v342_v18, %v343_v17 }
  0xb4   : > { %v346_v20 = vadd.f32 1e-05, %v344_v19 }
  0xb6   : > { %681 = vrsqrt.f32 %v346_v20 }
  0xc0   : > { %v682_v22 = vpop.eup %681 }
  0xc1   : > { %v348_v24 = vmul.f32 %v682_v22, %v345_v21 }
  0xc3   : > { %v356_v26 = vmul.f32 %v593_v23, %v348_v24 }
  0xc5   : > { %v364_v27 = vadd.f32 %v594_v25, %v356_v26 }
  0xc7   : > { %615 = vmatmul.mubr.msk.f32.vlgmr.msra.gmra.mrb[0].mxu0 %vm332_vm0, %v364_v27 }
 0x19a   : > { %v445_v29 = vpop.f32.mrb[0].mxu0 }
 0x19b   : > { %v446_v30 = vadd.f32 %v595_v28, %v445_v29  ;;  %v616_v31 = vpop.f32.mrb[1].mxu0 }
 0x19d   : > { %449 = vst.msk [vmem:[%s310_s27] sm:$0xff] %vm332_vm0, %v446_v30 }
 0x19e   : > { %696 = shalt.err (!%p693_p5)
}
 0x19f   : > { %s697_s16 = scalar_lea.hbm %s894_s11, 128  ;;  %s701_s19 = scalar_lea.hbm %s948_s6, 256 }
 0x1a0   : > { %p698_p6 = scmp.ne.s32.totalorder %s894_s11, %s697_s16  ;;  %p702_p10 = scmp.lt.u32.totalorder %s894_s11, %s948_s6 }
 0x1a1   : > { %p703_p11 = scmp.lt.u32.totalorder %s701_s19, %s697_s16  ;;  %p705_p13 = scmp.lt.u32.totalorder %s697_s16, %s894_s11 }
 0x1a2   : > { %p699_p7 = pnand %p698_p6, %p842_p4 }
 0x1a3   : > { %p704_p12 = por %p703_p11, %p702_p10 }
 0x1a4   : > { %p700_p9 = pneg %p699_p7 }
 0x1a5   : > { %p706_p0 = por %p705_p13, %p704_p12 }
 0x1a7   : > { %p707_p1 = pnand %p706_p0, %p700_p9 }
 0x1a9   : > { %710 = shalt.err (!%p707_p1)
}
 0x1aa   : > { %623 = dma.vmem_to_hbm [thread:$0]  (%p842_p4), %s896_s28, 128, %s894_s11, %s451_s12  }
 0x1ab PF: > { %p629_p2 = scmp.ge.s32.totalorder %s761_s26, 2  ;;  %s478_s30 = sand.u32 1, %s741_s21  }
 0x1ac   : > { %s479_s8 = scalar_lea.sflag [#allocation3], %s478_s30 }
 0x1ad   : > { %p626_p3 = pnand %p629_p2, %p849_p8 }
 0x1af   : > { %736 = dma.done.wait (!%p626_p3), %s479_s8, 128  }
 0x1b0   : > { %738 = vsyncadd (!%p626_p3), %s479_s8, 4294967168  ;;  %s19_s26 = sadd.s32 1, %s761_s26   ;;  %s951_s21 = smov %s745_s22 }
 0x1b1   : > { %p16_p5 = scmp.ge.s32.totalorder %s19_s26, 4   ;;  %s952_s22 = smov %s749_s23 }
 0x1b2   : > { %s953_s23 = smov %s855_s10  ;;  %s954_s24 = smov %s757_s25 }
 0x1b3   : > { %s955_s25 = smov %s957_s29  ;;  %18 = sbr.rel (!%p16_p5) target bundleno = 4 (0x4), region = 88 }
 0x1ba   :  { %484 = vsyncpa [#allocation3], 1 }
 0x1bb   :  { %486 = vsyncpa [#allocation3 + $0x1], 1 }

</bundles_post_ra>
